<compile_context>
chip_gen: v7x
topology: tpu7x:2x2x1
jax: 0.10.0
libtpu: 0.0.40
codegen_flags: <defaults>
</compile_context>

<pallas_src>
import functools
import numpy as np

import jax
import jax.numpy as jnp
from jax import lax
from jax.experimental import pallas as pl
from jax.experimental.pallas import tpu as pltpu


# x @ W^T without an XLU transpose: contract axis 1 of both operands.
_DN_T = (((1,), (1,)), ((), ()))


def _qkv_proj_kernel(q_ref, k_ref, v_ref,
                     wq_ref, wk_ref, wv_ref,
                     bq_ref, bk_ref, bv_ref,
                     qh_ref, kh_ref, vh_ref, *, scale):
    """Per-(batch, row-tile, head) projection: (TL, E) @ (D, E)^T -> (TL, D)."""
    xq = q_ref[0]                                   # (TL, E)
    xk = k_ref[0]
    xv = v_ref[0]

    q_p = lax.dot_general(xq, wq_ref[...], _DN_T,
                          preferred_element_type=jnp.float32) + bq_ref[0]
    k_p = lax.dot_general(xk, wk_ref[...], _DN_T,
                          preferred_element_type=jnp.float32) + bk_ref[0]
    v_p = lax.dot_general(xv, wv_ref[...], _DN_T,
                          preferred_element_type=jnp.float32) + bv_ref[0]

    # 1/sqrt(D) folded into q once (one VPU multiply per tile).
    qh_ref[0, 0] = (q_p * scale).astype(qh_ref.dtype)
    kh_ref[0, 0] = k_p.astype(kh_ref.dtype)
    vh_ref[0, 0] = v_p.astype(vh_ref.dtype)


def _flash_mha_kernel(q_ref, qh_ref, kh_ref, vh_ref,
                      wo_ref, bo_ref, gamma_ref, beta_ref,
                      out_ref,
                      m_scr, l_scr, ctx_scr, acc_scr, *, eps):
    """Grid (batch, q_tile, head, kv_tile): online softmax over kv tiles,
    per-head out-projection accumulated over the head axis, then residual +
    LayerNorm at the last (head, kv) step."""
    h = pl.program_id(2)
    kt = pl.program_id(3)
    n_h = pl.num_programs(2)
    n_kt = pl.num_programs(3)

    @pl.when(jnp.logical_and(h == 0, kt == 0))
    def _():
        acc_scr[...] = jnp.zeros_like(acc_scr)

    @pl.when(kt == 0)
    def _():
        m_scr[...] = jnp.full_like(m_scr, -jnp.inf)
        l_scr[...] = jnp.zeros_like(l_scr)
        ctx_scr[...] = jnp.zeros_like(ctx_scr)

    q_h = qh_ref[0, 0]                              # (TQ, D), already scaled
    k_h = kh_ref[0, 0]                              # (TK, D)
    v_h = vh_ref[0, 0]                              # (TK, D)

    # scores: q @ k^T (contract D of both) -> (TQ, TK), f32 accumulation.
    s = lax.dot_general(q_h, k_h, _DN_T, preferred_element_type=jnp.float32)

    m_prev = m_scr[...]
    m_new = jnp.maximum(m_prev, jnp.max(s, axis=-1, keepdims=True))
    alpha = jnp.exp(m_prev - m_new)
    p = jnp.exp(s - m_new)
    l_scr[...] = alpha * l_scr[...] + jnp.sum(p, axis=-1, keepdims=True)
    ctx_scr[...] = alpha * ctx_scr[...] + jnp.dot(
        p.astype(v_h.dtype), v_h, preferred_element_type=jnp.float32)
    m_scr[...] = m_new

    # After the last KV tile: normalize (exact division) and fold this head
    # into the out-projection accumulator via its (E, D) slice of Wo.
    @pl.when(kt == n_kt - 1)
    def _():
        ctx = ctx_scr[...] / l_scr[...]
        wo_h = wo_ref[0]                            # (E, D)
        acc_scr[...] += lax.dot_general(ctx.astype(wo_h.dtype), wo_h, _DN_T,
                                        preferred_element_type=jnp.float32)

    # After the last head: bias + residual + LayerNorm, single (TQ, E) store.
    @pl.when(jnp.logical_and(h == n_h - 1, kt == n_kt - 1))
    def _():
        x = q_ref[0].astype(jnp.float32) + acc_scr[...] + bo_ref[...]
        mu = jnp.mean(x, axis=-1, keepdims=True)
        var = jnp.mean((x - mu) ** 2, axis=-1, keepdims=True)
        y = (x - mu) * lax.rsqrt(var + eps)
        y = y * gamma_ref[...] + beta_ref[...]
        out_ref[0] = y.astype(out_ref.dtype)


def _pick_tile(n, candidates=(512, 256, 128, 64, 32, 16, 8)):
    for t in candidates:
        if t <= n and n % t == 0:
            return t
    return n


def multi_head_self_attention(q, k, v, params, num_heads, *,
                              compute_dtype=None, eps=1e-5):
    """Forward of MultiHeadSelfAttention: LayerNorm(q + MHA(q, k, v)).

    compute_dtype: dtype of the MXU matmul operands (None = keep input dtype;
    pass jnp.bfloat16 for the MXU-native path, accumulation stays f32)."""
    wq, wk, wv, bq, bk, bv, wo, bo, gamma, beta = params
    B, L, E = q.shape
    assert k.shape == q.shape and v.shape == q.shape, "self-attention shapes"
    H = num_heads
    assert E % H == 0, "embed_dim must be divisible by num_heads"
    D = E // H
    assert D % 8 == 0, "head_dim must be a multiple of 8 (sublane constraint)"

    cdt = compute_dtype if compute_dtype is not None else q.dtype
    f32 = jnp.float32
    scale = 1.0 / float(np.sqrt(D))
    itemsize_c = np.dtype(cdt).itemsize

    TL = _pick_tile(L)   # projection row tile
    TQ = _pick_tile(L)   # query tile
    TK = _pick_tile(L)   # kv tile
    n_lt, n_qt, n_kt = L // TL, L // TQ, L // TK

    qc, kc, vc = q.astype(cdt), k.astype(cdt), v.astype(cdt)
    wqc, wkc, wvc = wq.astype(cdt), wk.astype(cdt), wv.astype(cdt)
    bq3 = bq.reshape(H, 1, D).astype(f32)
    bk3 = bk.reshape(H, 1, D).astype(f32)
    bv3 = bv.reshape(H, 1, D).astype(f32)

    # ---------- kernel 1: per-head QKV projection -> (B, H, L, D) each -------
    proj_cost = pl.CostEstimate(
        flops=int(6 * B * L * E * E),
        transcendentals=0,
        bytes_accessed=int((3 * B * L * E + 3 * E * E) * itemsize_c
                           + 3 * E * 4
                           + 3 * B * H * L * D * itemsize_c))

    row_spec = pl.BlockSpec((1, TL, E), lambda b, lt, h: (b, lt, 0))
    w_spec = pl.BlockSpec((D, E), lambda b, lt, h: (h, 0))
    b_spec = pl.BlockSpec((1, 1, D), lambda b, lt, h: (h, 0, 0))
    head_out_spec = pl.BlockSpec((1, 1, TL, D), lambda b, lt, h: (b, h, lt, 0))

    qh, kh, vh = pl.pallas_call(
        functools.partial(_qkv_proj_kernel, scale=scale),
        out_shape=(jax.ShapeDtypeStruct((B, H, L, D), cdt),) * 3,
        grid=(B, n_lt, H),
        in_specs=[row_spec, row_spec, row_spec,
                  w_spec, w_spec, w_spec,
                  b_spec, b_spec, b_spec],
        out_specs=(head_out_spec, head_out_spec, head_out_spec),
        compiler_params=pltpu.CompilerParams(
            dimension_semantics=("parallel", "parallel", "parallel"),
            vmem_limit_bytes=32 * 1024 * 1024),
        cost_estimate=proj_cost,
    )(qc, kc, vc, wqc, wkc, wvc, bq3, bk3, bv3)

    # ---------- kernel 2: flash attention + out-proj + residual + LayerNorm --
    # Wo sliced per head: wo3[h] = Wo[:, h*D:(h+1)*D]  (shape (H, E, D)).
    wo3 = wo.reshape(E, H, D).transpose(1, 0, 2).astype(cdt)
    bo2 = bo.reshape(1, E).astype(f32)
    g2 = gamma.reshape(1, E).astype(f32)
    bt2 = beta.reshape(1, E).astype(f32)

    attn_cost = pl.CostEstimate(
        flops=int(4 * B * H * L * L * D + 2 * B * L * E * E),
        transcendentals=int(B * H * L * L),
        bytes_accessed=int((3 * B * H * L * D + E * E) * itemsize_c
                           + 2 * B * L * E * q.dtype.itemsize + 3 * E * 4))

    out = pl.pallas_call(
        functools.partial(_flash_mha_kernel, eps=eps),
        out_shape=jax.ShapeDtypeStruct((B, L, E), q.dtype),
        grid=(B, n_qt, H, n_kt),
        in_specs=[
            pl.BlockSpec((1, TQ, E), lambda b, qt, h, kt: (b, qt, 0)),        # residual q
            pl.BlockSpec((1, 1, TQ, D), lambda b, qt, h, kt: (b, h, qt, 0)),  # q_h
            pl.BlockSpec((1, 1, TK, D), lambda b, qt, h, kt: (b, h, kt, 0)),  # k_h
            pl.BlockSpec((1, 1, TK, D), lambda b, qt, h, kt: (b, h, kt, 0)),  # v_h
            pl.BlockSpec((1, E, D), lambda b, qt, h, kt: (h, 0, 0)),          # Wo head slice
            pl.BlockSpec((1, E), lambda b, qt, h, kt: (0, 0)),                # bo
            pl.BlockSpec((1, E), lambda b, qt, h, kt: (0, 0)),                # gamma
            pl.BlockSpec((1, E), lambda b, qt, h, kt: (0, 0)),                # beta
        ],
        out_specs=pl.BlockSpec((1, TQ, E), lambda b, qt, h, kt: (b, qt, 0)),
        scratch_shapes=[
            pltpu.VMEM((TQ, 1), jnp.float32),   # running max
            pltpu.VMEM((TQ, 1), jnp.float32),   # running denom
            pltpu.VMEM((TQ, D), jnp.float32),   # running context (per head)
            pltpu.VMEM((TQ, E), jnp.float32),   # out-projection accumulator
        ],
        compiler_params=pltpu.CompilerParams(
            dimension_semantics=("parallel", "parallel", "arbitrary", "arbitrary"),
            vmem_limit_bytes=32 * 1024 * 1024),
        cost_estimate=attn_cost,
    )(q, qh, kh, vh, wo3, bo2, g2, bt2)

    return out


def reference_jax(q, k, v, params, num_heads):
    wq, wk, wv, bq, bk, bv, wo, bo, gamma, beta = params
    B, L, E = q.shape
    D = E // num_heads
    scale = 1.0 / np.sqrt(D)
    qp = q @ wq.T + bq
    kp = k @ wk.T + bk
    vp = v @ wv.T + bv
    qh = qp.reshape(B, L, num_heads, D).transpose(0, 2, 1, 3)
    kh = kp.reshape(B, L, num_heads, D).transpose(0, 2, 1, 3)
    vh = vp.reshape(B, L, num_heads, D).transpose(0, 2, 1, 3)
    s = jnp.einsum('bhld,bhmd->bhlm', qh, kh) * scale
    p = jax.nn.softmax(s, axis=-1)
    o = jnp.einsum('bhlm,bhmd->bhld', p, vh)
    o = o.transpose(0, 2, 1, 3).reshape(B, L, E)
    attn_out = o @ wo.T + bo
    x = q + attn_out
    mu = x.mean(-1, keepdims=True)
    var = ((x - mu) ** 2).mean(-1, keepdims=True)
    return (x - mu) / jnp.sqrt(var + 1e-5) * gamma + beta


if __name__ == "__main__":
    B, L, E, H = 2, 8, 32, 4

    key = jax.random.PRNGKey(0)
    keys = jax.random.split(key, 8)
    q = jax.random.normal(keys[0], (B, L, E), jnp.float32)
    k = jax.random.normal(keys[1], (B, L, E), jnp.float32)
    v = jax.random.normal(keys[2], (B, L, E), jnp.float32)

    # deterministic synthetic parameters (shapes match nn.MultiheadAttention + LayerNorm)
    wq = 0.05 * jax.random.normal(keys[3], (E, E), jnp.float32)
    wk = 0.05 * jax.random.normal(keys[4], (E, E), jnp.float32)
    wv = 0.05 * jax.random.normal(keys[5], (E, E), jnp.float32)
    bq = jnp.zeros((E,), jnp.float32)
    bk = jnp.zeros((E,), jnp.float32)
    bv = jnp.zeros((E,), jnp.float32)
    wo = 0.05 * jax.random.normal(keys[6], (E, E), jnp.float32)
    bo = jnp.zeros((E,), jnp.float32)
    gamma = jnp.ones((E,), jnp.float32)
    beta = jnp.zeros((E,), jnp.float32)
    params = (wq, wk, wv, bq, bk, bv, wo, bo, gamma, beta)

    ref = reference_jax(q, k, v, params, H)

    # f32 operand path: exact softmax division + f32 accumulation -> tight check.
    out = multi_head_self_attention(q, k, v, params, H)
    out = jax.block_until_ready(out)
    np.testing.assert_allclose(np.asarray(out), np.asarray(ref),
                               atol=1e-4, rtol=1e-4)

    # bf16 MXU-operand path (f32 accumulation, f32 softmax/LayerNorm) -> looser check.
    out_bf16 = multi_head_self_attention(q, k, v, params, H,
                                         compute_dtype=jnp.bfloat16)
    out_bf16 = jax.block_until_ready(out_bf16)
    np.testing.assert_allclose(np.asarray(out_bf16), np.asarray(ref),
                               atol=3e-2, rtol=3e-2)

    print("KERNEL_OK")
</pallas_src>

<mosaic_0001>
module attributes {stable_mosaic.version = 11 : i64} {
  func.func @_qkv_proj_kernel(%arg0: i32, %arg1: i32, %arg2: i32, %arg3: memref<1x8x32xf32, #tpu.memory_space<vmem>>, %arg4: memref<1x8x32xf32, #tpu.memory_space<vmem>>, %arg5: memref<1x8x32xf32, #tpu.memory_space<vmem>>, %arg6: memref<8x32xf32, #tpu.memory_space<vmem>>, %arg7: memref<8x32xf32, #tpu.memory_space<vmem>>, %arg8: memref<8x32xf32, #tpu.memory_space<vmem>>, %arg9: memref<1x1x8xf32, #tpu.memory_space<vmem>>, %arg10: memref<1x1x8xf32, #tpu.memory_space<vmem>>, %arg11: memref<1x1x8xf32, #tpu.memory_space<vmem>>, %arg12: memref<1x1x8x8xf32, #tpu.memory_space<vmem>>, %arg13: memref<1x1x8x8xf32, #tpu.memory_space<vmem>>, %arg14: memref<1x1x8x8xf32, #tpu.memory_space<vmem>>) attributes {dimension_semantics = [#tpu.dimension_semantics<parallel>, #tpu.dimension_semantics<parallel>, #tpu.dimension_semantics<parallel>], iteration_bounds = array<i64: 2, 1, 4>, scalar_prefetch = 0 : i64, scratch_operands = 0 : i64, tpu.core_type = #tpu.core_type<tc>, window_params = [{transform_indices = @transform_0, window_bounds = array<i64: 1, 8, 32>}, {transform_indices = @transform_1, window_bounds = array<i64: 1, 8, 32>}, {transform_indices = @transform_2, window_bounds = array<i64: 1, 8, 32>}, {transform_indices = @transform_3, window_bounds = array<i64: 8, 32>}, {transform_indices = @transform_4, window_bounds = array<i64: 8, 32>}, {transform_indices = @transform_5, window_bounds = array<i64: 8, 32>}, {transform_indices = @transform_6, window_bounds = array<i64: 1, 1, 8>}, {transform_indices = @transform_7, window_bounds = array<i64: 1, 1, 8>}, {transform_indices = @transform_8, window_bounds = array<i64: 1, 1, 8>}, {transform_indices = @transform_9, window_bounds = array<i64: 1, 1, 8, 8>}, {transform_indices = @transform_10, window_bounds = array<i64: 1, 1, 8, 8>}, {transform_indices = @transform_11, window_bounds = array<i64: 1, 1, 8, 8>}]} {
    %c0 = arith.constant 0 : index
    %c0_0 = arith.constant 0 : index
    %c0_1 = arith.constant 0 : index
    %0 = vector.load %arg3[%c0, %c0_0, %c0_1] : memref<1x8x32xf32, #tpu.memory_space<vmem>>, vector<1x8x32xf32>
    %1 = vector.shape_cast %0 : vector<1x8x32xf32> to vector<8x32xf32>
    %c0_2 = arith.constant 0 : index
    %c0_3 = arith.constant 0 : index
    %c0_4 = arith.constant 0 : index
    %2 = vector.load %arg4[%c0_2, %c0_3, %c0_4] : memref<1x8x32xf32, #tpu.memory_space<vmem>>, vector<1x8x32xf32>
    %3 = vector.shape_cast %2 : vector<1x8x32xf32> to vector<8x32xf32>
    %c0_5 = arith.constant 0 : index
    %c0_6 = arith.constant 0 : index
    %c0_7 = arith.constant 0 : index
    %4 = vector.load %arg5[%c0_5, %c0_6, %c0_7] : memref<1x8x32xf32, #tpu.memory_space<vmem>>, vector<1x8x32xf32>
    %5 = vector.shape_cast %4 : vector<1x8x32xf32> to vector<8x32xf32>
    %c0_8 = arith.constant 0 : index
    %c0_9 = arith.constant 0 : index
    %6 = vector.load %arg6[%c0_8, %c0_9] : memref<8x32xf32, #tpu.memory_space<vmem>>, vector<8x32xf32>
    %cst = arith.constant dense<0.000000e+00> : vector<8x8xf32>
    %7 = tpu.matmul %1, %6, %cst {dimension_numbers = #tpu.dot_dimension_numbers<[1], [1], [0], [0], [0, 0, 1, 0], [], []>} : vector<8x32xf32>, vector<8x32xf32>, vector<8x8xf32> -> vector<8x8xf32>
    %c0_10 = arith.constant 0 : index
    %c0_11 = arith.constant 0 : index
    %c0_12 = arith.constant 0 : index
    %8 = vector.load %arg9[%c0_10, %c0_11, %c0_12] : memref<1x1x8xf32, #tpu.memory_space<vmem>>, vector<1x1x8xf32>
    %9 = vector.shape_cast %8 : vector<1x1x8xf32> to vector<1x8xf32>
    %10 = vector.broadcast %9 : vector<1x8xf32> to vector<8x8xf32>
    %11 = arith.addf %7, %10 : vector<8x8xf32>
    %c0_13 = arith.constant 0 : index
    %c0_14 = arith.constant 0 : index
    %12 = vector.load %arg7[%c0_13, %c0_14] : memref<8x32xf32, #tpu.memory_space<vmem>>, vector<8x32xf32>
    %cst_15 = arith.constant dense<0.000000e+00> : vector<8x8xf32>
    %13 = tpu.matmul %3, %12, %cst_15 {dimension_numbers = #tpu.dot_dimension_numbers<[1], [1], [0], [0], [0, 0, 1, 0], [], []>} : vector<8x32xf32>, vector<8x32xf32>, vector<8x8xf32> -> vector<8x8xf32>
    %c0_16 = arith.constant 0 : index
    %c0_17 = arith.constant 0 : index
    %c0_18 = arith.constant 0 : index
    %14 = vector.load %arg10[%c0_16, %c0_17, %c0_18] : memref<1x1x8xf32, #tpu.memory_space<vmem>>, vector<1x1x8xf32>
    %15 = vector.shape_cast %14 : vector<1x1x8xf32> to vector<1x8xf32>
    %16 = vector.broadcast %15 : vector<1x8xf32> to vector<8x8xf32>
    %17 = arith.addf %13, %16 : vector<8x8xf32>
    %c0_19 = arith.constant 0 : index
    %c0_20 = arith.constant 0 : index
    %18 = vector.load %arg8[%c0_19, %c0_20] : memref<8x32xf32, #tpu.memory_space<vmem>>, vector<8x32xf32>
    %cst_21 = arith.constant dense<0.000000e+00> : vector<8x8xf32>
    %19 = tpu.matmul %5, %18, %cst_21 {dimension_numbers = #tpu.dot_dimension_numbers<[1], [1], [0], [0], [0, 0, 1, 0], [], []>} : vector<8x32xf32>, vector<8x32xf32>, vector<8x8xf32> -> vector<8x8xf32>
    %c0_22 = arith.constant 0 : index
    %c0_23 = arith.constant 0 : index
    %c0_24 = arith.constant 0 : index
    %20 = vector.load %arg11[%c0_22, %c0_23, %c0_24] : memref<1x1x8xf32, #tpu.memory_space<vmem>>, vector<1x1x8xf32>
    %21 = vector.shape_cast %20 : vector<1x1x8xf32> to vector<1x8xf32>
    %22 = vector.broadcast %21 : vector<1x8xf32> to vector<8x8xf32>
    %23 = arith.addf %19, %22 : vector<8x8xf32>
    %cst_25 = arith.constant 0.353553385 : f32
    %24 = vector.broadcast %cst_25 : f32 to vector<8x8xf32>
    %25 = arith.mulf %11, %24 : vector<8x8xf32>
    %c0_26 = arith.constant 0 : index
    %c0_27 = arith.constant 0 : index
    %c0_28 = arith.constant 0 : index
    %c0_29 = arith.constant 0 : index
    %26 = vector.load %arg12[%c0_26, %c0_27, %c0_28, %c0_29] : memref<1x1x8x8xf32, #tpu.memory_space<vmem>>, vector<1x1x8x8xf32>
    %27 = vector.shape_cast %26 : vector<1x1x8x8xf32> to vector<8x8xf32>
    %28 = vector.shape_cast %25 : vector<8x8xf32> to vector<1x1x8x8xf32>
    tpu.vector_store %arg12[%c0_26, %c0_27, %c0_28, %c0_29], %28 {strides = array<i32>} : memref<1x1x8x8xf32, #tpu.memory_space<vmem>>, vector<1x1x8x8xf32>,
    %c0_30 = arith.constant 0 : index
    %c0_31 = arith.constant 0 : index
    %c0_32 = arith.constant 0 : index
    %c0_33 = arith.constant 0 : index
    %29 = vector.load %arg13[%c0_30, %c0_31, %c0_32, %c0_33] : memref<1x1x8x8xf32, #tpu.memory_space<vmem>>, vector<1x1x8x8xf32>
    %30 = vector.shape_cast %29 : vector<1x1x8x8xf32> to vector<8x8xf32>
    %31 = vector.shape_cast %17 : vector<8x8xf32> to vector<1x1x8x8xf32>
    tpu.vector_store %arg13[%c0_30, %c0_31, %c0_32, %c0_33], %31 {strides = array<i32>} : memref<1x1x8x8xf32, #tpu.memory_space<vmem>>, vector<1x1x8x8xf32>,
    %c0_34 = arith.constant 0 : index
    %c0_35 = arith.constant 0 : index
    %c0_36 = arith.constant 0 : index
    %c0_37 = arith.constant 0 : index
    %32 = vector.load %arg14[%c0_34, %c0_35, %c0_36, %c0_37] : memref<1x1x8x8xf32, #tpu.memory_space<vmem>>, vector<1x1x8x8xf32>
    %33 = vector.shape_cast %32 : vector<1x1x8x8xf32> to vector<8x8xf32>
    %34 = vector.shape_cast %23 : vector<8x8xf32> to vector<1x1x8x8xf32>
    tpu.vector_store %arg14[%c0_34, %c0_35, %c0_36, %c0_37], %34 {strides = array<i32>} : memref<1x1x8x8xf32, #tpu.memory_space<vmem>>, vector<1x1x8x8xf32>,
    return
  }
  func.func @transform_0(%arg0: i32, %arg1: i32, %arg2: i32) -> (i32, i32, i32) {
    %c0_i32 = arith.constant 0 : i32
    %c0_i32_0 = arith.constant 0 : i32
    return %arg0, %arg1, %c0_i32 : i32, i32, i32
  }
  func.func @transform_1(%arg0: i32, %arg1: i32, %arg2: i32) -> (i32, i32, i32) {
    %c0_i32 = arith.constant 0 : i32
    %c0_i32_0 = arith.constant 0 : i32
    return %arg0, %arg1, %c0_i32 : i32, i32, i32
  }
  func.func @transform_2(%arg0: i32, %arg1: i32, %arg2: i32) -> (i32, i32, i32) {
    %c0_i32 = arith.constant 0 : i32
    %c0_i32_0 = arith.constant 0 : i32
    return %arg0, %arg1, %c0_i32 : i32, i32, i32
  }
  func.func @transform_3(%arg0: i32, %arg1: i32, %arg2: i32) -> (i32, i32) {
    %c0_i32 = arith.constant 0 : i32
    %c0_i32_0 = arith.constant 0 : i32
    return %arg2, %c0_i32 : i32, i32
  }
  func.func @transform_4(%arg0: i32, %arg1: i32, %arg2: i32) -> (i32, i32) {
    %c0_i32 = arith.constant 0 : i32
    %c0_i32_0 = arith.constant 0 : i32
    return %arg2, %c0_i32 : i32, i32
  }
  func.func @transform_5(%arg0: i32, %arg1: i32, %arg2: i32) -> (i32, i32) {
    %c0_i32 = arith.constant 0 : i32
    %c0_i32_0 = arith.constant 0 : i32
    return %arg2, %c0_i32 : i32, i32
  }
  func.func @transform_6(%arg0: i32, %arg1: i32, %arg2: i32) -> (i32, i32, i32) {
    %c0_i32 = arith.constant 0 : i32
    %c0_i32_0 = arith.constant 0 : i32
    %c0_i32_1 = arith.constant 0 : i32
    return %arg2, %c0_i32, %c0_i32_0 : i32, i32, i32
  }
  func.func @transform_7(%arg0: i32, %arg1: i32, %arg2: i32) -> (i32, i32, i32) {
    %c0_i32 = arith.constant 0 : i32
    %c0_i32_0 = arith.constant 0 : i32
    %c0_i32_1 = arith.constant 0 : i32
    return %arg2, %c0_i32, %c0_i32_0 : i32, i32, i32
  }
  func.func @transform_8(%arg0: i32, %arg1: i32, %arg2: i32) -> (i32, i32, i32) {
    %c0_i32 = arith.constant 0 : i32
    %c0_i32_0 = arith.constant 0 : i32
    %c0_i32_1 = arith.constant 0 : i32
    return %arg2, %c0_i32, %c0_i32_0 : i32, i32, i32
  }
  func.func @transform_9(%arg0: i32, %arg1: i32, %arg2: i32) -> (i32, i32, i32, i32) {
    %c0_i32 = arith.constant 0 : i32
    %c0_i32_0 = arith.constant 0 : i32
    return %arg0, %arg2, %arg1, %c0_i32 : i32, i32, i32, i32
  }
  func.func @transform_10(%arg0: i32, %arg1: i32, %arg2: i32) -> (i32, i32, i32, i32) {
    %c0_i32 = arith.constant 0 : i32
    %c0_i32_0 = arith.constant 0 : i32
    return %arg0, %arg2, %arg1, %c0_i32 : i32, i32, i32, i32
  }
  func.func @transform_11(%arg0: i32, %arg1: i32, %arg2: i32) -> (i32, i32, i32, i32) {
    %c0_i32 = arith.constant 0 : i32
    %c0_i32_0 = arith.constant 0 : i32
    return %arg0, %arg2, %arg1, %c0_i32 : i32, i32, i32, i32
  }
}

</mosaic_0001>

<bundles_post_ra>
// kernel: tpu_custom_call.1
= control target key start
LH: loop header
LB: loop body
LE: loop exit
PB: predicated region body
PF: predicated region fallthrough
CT: control target
= control target key end

     0   :  { %s2588_s0 = inlined_call_operand.hbm [shape: f32[2,8,32], index: 0, kind: input, shape index: {}]   ;;  %s2589_s1 = inlined_call_operand.hbm [shape: f32[2,8,32], index: 1, kind: input, shape index: {}]   ;;  %s2590_s2 = inlined_call_operand.hbm [shape: f32[2,8,32], index: 2, kind: input, shape index: {}]   ;;  %s2591_s3 = inlined_call_operand.hbm [shape: f32[32,32], index: 3, kind: input, shape index: {}]   ;;  %s2592_s4 = inlined_call_operand.hbm [shape: f32[32,32], index: 4, kind: input, shape index: {}]   ;;  %s2593_s5 = inlined_call_operand.hbm [shape: f32[32,32], index: 5, kind: input, shape index: {}]   ;;  %s2594_s6 = inlined_call_operand.vmem [shape: f32[4,1,8], index: 6, kind: input, shape index: {}]   ;;  %s2595_s7 = inlined_call_operand.vmem [shape: f32[4,1,8], index: 7, kind: input, shape index: {}]   ;;  %s2596_s8 = inlined_call_operand.vmem [shape: f32[4,1,8], index: 8, kind: input, shape index: {}]   ;;  %s2597_s9 = inlined_call_operand.hbm [shape: f32[2,4,8,8], index: 9, kind: output, shape index: {0}]   ;;  %s2598_s10 = inlined_call_operand.hbm [shape: f32[2,4,8,8], index: 10, kind: output, shape index: {1}]   ;;  %s2599_s11 = inlined_call_operand.hbm [shape: f32[2,4,8,8], index: 11, kind: output, shape index: {2}]  }
   0x1   :  { %2639 = sst [smem:[#allocation42_spill]] %s2588_s0 }
   0x2   :  { %2640 = sst [smem:[#allocation43_spill]] %s2589_s1 }
   0x3   :  { %2641 = sst [smem:[#allocation44_spill]] %s2591_s3 }
   0x4   :  { %2642 = sst [smem:[#allocation45_spill]] %s2594_s6 }
   0x5   :  { %2643 = sst [smem:[#allocation46_spill]] %s2595_s7 }
   0x6   :  { %2644 = sst [smem:[#allocation47_spill]] %s2596_s8 }
   0x7   :  { %2645 = sst [smem:[#allocation48_spill]] %s2597_s9 }
   0x8   :  { %2646 = sst [smem:[#allocation49_spill]] %s2598_s10 }
   0x9   :  { %2647 = sst [smem:[#allocation50_spill]] %s2599_s11 }
   0xa   :  { %17 = vsyncpa [#allocation3], 0 }
   0xb   :  { %19 = vsyncpa [#allocation3 + $0x1], 0 }
   0xc   :  { %20 = vsyncpa [#allocation6], 0 }
   0xd   :  { %22 = vsyncpa [#allocation6 + $0x1], 0 }
   0xe   :  { %23 = vsyncpa [#allocation9], 0 }
   0xf   :  { %25 = vsyncpa [#allocation9 + $0x1], 0 }
  0x10   :  { %26 = vsyncpa [#allocation12], 0 }
  0x11   :  { %28 = vsyncpa [#allocation12 + $0x1], 0 }
  0x12   :  { %29 = vsyncpa [#allocation4], 0 }
  0x13   :  { %31 = vsyncpa [#allocation4 + $0x1], 0 }
  0x14   :  { %32 = vsyncpa [#allocation15], 0 }
  0x15   :  { %34 = vsyncpa [#allocation15 + $0x1], 0  ;;  %s1995_s17 = smov 0   ;;  %s1997_s18 = smov 0  }
  0x16   :  { %s1999_s19 = smov 0   ;;  %s2001_s20 = smov 0  }
  0x17   :  { %s2003_s21 = smov 0   ;;  %s2005_s22 = smov 0  }
  0x18   :  { %s2007_s23 = smov 0   ;;  %s2009_s24 = smov 0  }
  0x19   :  { %s2011_s25 = smov 0   ;;  %s2013_s26 = smov 0  }
  0x1a   :  { %s2015_s27 = smov 0   ;;  %s2017_s28 = smov 0  }
  0x1b   :  { %s2019_s29 = smov 0   ;;  %s2021_s30 = smov 0  }
  0x1c LB: > { %2648 = sst [smem:[#allocation23_spill]] %s1870_s17  ;;  %s2064_s12 = sadd.s32 4294967295, %s1922_s30   ;;  %s1922_s30 = sphi %s2021_s30, %s40_s30   ;;  %s1918_s29 = sphi %s2019_s29, %s2731_s29   ;;  %s1914_s28 = sphi %s2017_s28, %s2730_s28   ;;  %s1910_s27 = sphi %s2015_s27, %s2738_s27   ;;  %s1906_s26 = sphi %s2013_s26, %s2728_s26   ;;  %s1902_s25 = sphi %s2011_s25, %s2737_s25   ;;  %s1898_s24 = sphi %s2009_s24, %s2736_s24   ;;  %s1894_s23 = sphi %s2007_s23, %s2726_s23   ;;  %s1890_s22 = sphi %s2005_s22, %s2735_s22   ;;  %s1886_s21 = sphi %s2003_s21, %s2734_s21   ;;  %s1882_s20 = sphi %s2001_s20, %s2724_s20   ;;  %s1878_s19 = sphi %s1999_s19, %s2723_s19   ;;  %s1874_s18 = sphi %s1997_s18, %s2733_s18   ;;  %s1870_s17 = sphi %s1995_s17, %s2732_s17  }
  0x1d   : > { %2649 = sst [smem:[#allocation24_spill]] %s1878_s19  ;;  %p75_p0 = scmp.ne.s32.totalorder %s1902_s25, %s1898_s24 }
  0x1e   : > { %2650 = sst [smem:[#allocation25_spill]] %s1886_s21  ;;  %p2611_p1 = scmp.eq.s32.totalorder %s1922_s30, 0 }
  0x1f   : > { %2651 = sst [smem:[#allocation26_spill]] %s1898_s24  ;;  %p81_p2 = scmp.ne.s32.totalorder %s1898_s24, %s1894_s23 }
  0x20   : > { %2652 = sst [smem:[#allocation27_spill]] %s1906_s26  ;;  %p2609_p3 = scmp.eq.s32.totalorder %s2064_s12, 0 }
  0x21   : > { %2653 = sst [smem:[#allocation28_spill]] %s1910_s27  ;;  %p77_p5 = por %p2611_p1, %p75_p0 }
  0x22   : > { %2654 = sst [smem:[#allocation29_spill]] %s1914_s28  ;;  %p2078_p6 = por %p2609_p3, %p81_p2 }
  0x23   : > { %2655 = sst [smem:[#allocation30_spill]] %s1918_s29  ;;  %p2608_p7 = scmp.lt.s32.totalorder %s1922_s30, 8 }
  0x24   : > { %2656 = sst [smem:[#allocation31_spill]] %s1922_s30  ;;  %s2603_s16 = sand.u32 1, %s1902_s25  }
  0x25   : > { %s2657_s15 = scalar_select %p2078_p6, 1, 0 }
  0x26   : > { %s2085_s11 = sshll.u32 %s1918_s29, 7  ;;  %s2089_s14 = sshll.u32 %s2603_s16, 3 }
  0x27   : > { %2658 = sst [smem:[#allocation32_spill]] %s2657_s15  ;;  %p2093_p8 = pnand %p2608_p7, %p77_p5 }
  0x28   : > { %s2610_s13 = sand.u32 1, %s1922_s30   ;;  %s2660_s1 = sld [smem:[#allocation43_spill]] }
  0x29   : > { %s2659_s23 = scalar_select %p2093_p8, 1, 0 }
  0x2a   : > { %s430_s7 = scalar_lea.vmem [#allocation5], %s2089_s14  ;;  %s2110_s6 = scalar_lea.sflag [#allocation6], %s2610_s13 }
  0x2b   : > { %s438_s16 = sshll.u32 %s430_s7, 4  ;;  %p2116_p11 = pneg %p2093_p8  ;;  %s2105_s16 = int_to_ptr.vmem [resolvable:$true] %s438_s16 }
  0x2d   : > { %s2661_s26 = scalar_select %p2116_p11, 1, 0 }
  0x2e   : > { %s2102_s8 = scalar_lea.hbm %s2660_s1, %s2085_s11  ;;  %s1529_s7 = scalar_lea.hbm %s2660_s1, 256 }
  0x2f   : > { %s1524_s27 = scalar_lea.hbm %s2102_s8, 128  ;;  %p1530_p0 = scmp.lt.u32.totalorder %s2102_s8, %s2660_s1 }
  0x30   : > { %p1525_p10 = scmp.ne.s32.totalorder %s2102_s8, %s1524_s27  ;;  %p1531_p2 = scmp.lt.u32.totalorder %s1529_s7, %s1524_s27 }
  0x31   : > { %p1533_p7 = scmp.lt.u32.totalorder %s1524_s27, %s2102_s8 }
  0x32   : > { %p1527_p12 = pnand %p2116_p11, %p1525_p10  ;;  %p1532_p5 = por %p1531_p2, %p1530_p0 }
  0x34   : > { %p1528_p13 = pneg %p1527_p12  ;;  %p1534_p4 = por %p1533_p7, %p1532_p5 }
  0x36   : > { %p1535_p3 = pnand %p1534_p4, %p1528_p13 }
  0x38   : > { %1538 = shalt.err (!%p1535_p3)
}
  0x39   : > { %s1539_s13 = scalar_lea.vmem %s2105_s16, 128  ;;  %s1924_s9 = smov [#allocation5]  }
  0x3a   : > { %p1540_p10 = scmp.ne.s32.totalorder %s2105_s16, %s1539_s13  ;;  %s1544_s10 = sshll.u32 %s1924_s9, 4  ;;  %s1545_s10 = int_to_ptr.vmem [resolvable:$false] %s1544_s10 }
  0x3b   : > { %s1546_s24 = scalar_lea.vmem %s1545_s10, 256  ;;  %p1547_p9 = scmp.lt.s32.totalorder %s2105_s16, %s1545_s10 }
  0x3c   : > { %p1542_p12 = pnand %p1540_p10, %p2116_p11  ;;  %p1548_p6 = scmp.lt.s32.totalorder %s1546_s24, %s1539_s13 }
  0x3e   : > { %p1543_p1 = pneg %p1542_p12  ;;  %p1549_p0 = por %p1548_p6, %p1547_p9 }
  0x40   : > { %p1550_p2 = pnand %p1549_p0, %p1543_p1 }
  0x42   : > { %1553 = shalt.err (!%p1550_p2)
}
  0x43   : > { %1385 = dma.hbm_to_vmem [thread:$0]  (!%p2093_p8), %s2102_s8, 128, %s2105_s16, %s2110_s6  }
  0x44   : > { %p534_p1 = scmp.lt.s32.totalorder %s1922_s30, 9  ;;  %p2662_p3 = scmp.ge.s32.totalorder %s1922_s30, 1 }
  0x45   : > { %s52_s15 = sadd.s32 1, %s1914_s28  ;;  %s150_s7 = sadd.s32 1, %s1890_s22 }
  0x46   : > { %p2143_p4 = pnand %p2662_p3, %p534_p1  ;;  %p53_p6 = scmp.ge.s32.totalorder %s52_s15, 4 }
  0x47   : > { %p157_p7 = scmp.ne.s32.totalorder %s1890_s22, %s1886_s21  ;;  %p163_p9 = scmp.ne.s32.totalorder %s1886_s21, %s1882_s20 }
  0x48   : > { %s2663_s27 = scalar_select %p2143_p4, 1, 0 }
  0x49   : > { %s2740_s15 = smov (%p53_p6, %s52_s15), 0  ;;  %s2666_s8 = sadd.s32 1, %s1918_s29 }
  0x4a   : > { %2664 = sst [smem:[#allocation33_spill]] %s2663_s27  ;;  %s2742_s8 = smov (!%p53_p6, %s2666_s8), %s1918_s29 }
  0x4b   : > { %2665 = sst [smem:[#allocation34_spill]] %s2740_s15  ;;  %s147_s16 = ssub.s32 %s1914_s28, %s2740_s15 }
  0x4c   : > { %p2667_p13 = scmp.eq.s32.totalorder %s1922_s30, 0  ;;  %p61_p10 = scmp.ge.s32.totalorder %s2742_s8, 2 }
  0x4d   : > { %p148_p12 = scmp.eq.s32.totalorder %s147_s16, 0  ;;  %p2669_p0 = scmp.eq.s32.totalorder %s2064_s12, 0 }
  0x4e   : > { %p2163_p5 = por %p157_p7, %p2667_p13  ;;  %s310_s10 = sadd.s32 1, %s1878_s19 }
  0x4f   : > { %p2169_p2 = por %p163_p9, %p2669_p0  ;;  %s2744_s8 = smov (%p61_p10, %s2742_s8), 0 }
  0x50   : > { %2672 = sst [smem:[#allocation36_spill]] %s2744_s8  ;;  %s63_s13 = ssub.s32 %s1918_s29, %s2744_s8 }
  0x51   : > { %s2670_s20 = scalar_select %p2169_p2, 1, 0 }
  0x52   : > { %s2177_s24 = scalar_select %p148_p12, %s1890_s22, %s150_s7  }
  0x53   : > { %2671 = sst [smem:[#allocation35_spill]] %s2670_s20  ;;  %p320_p1 = scmp.ne.s32.totalorder %s1878_s19, %s1874_s18 }
  0x54   : > { %2673 = sst [smem:[#allocation37_spill]] %s2177_s24  ;;  %p66_p3 = scmp.eq.s32.totalorder %s63_s13, 0 }
  0x55   : > { %s305_s1 = sor.u32 %s147_s16, %s63_s13  ;;  %p2674_p7 = scmp.eq.s32.totalorder %s2064_s12, 7 }
  0x56   : > { %p308_p6 = scmp.eq.s32.totalorder %s305_s1, 0  ;;  %s2677_s20 = sadd.s32 1, %s1902_s25 }
  0x57   : > { %p2185_p9 = por %p2674_p7, %p320_p1  ;;  %p326_p13 = scmp.ne.s32.totalorder %s1874_s18, %s1870_s17 }
  0x58   : > { %s2192_s21 = scalar_select %p66_p3, %s1902_s25, %s2677_s20  }
  0x59   : > { %s2675_s15 = scalar_select %p2185_p9, 1, 0 }
  0x5a   : > { %2678 = sst [smem:[#allocation39_spill]] %s2192_s21  ;;  %s2680_s7 = sadd.s32 4294967294, %s1922_s30  }
  0x5b   : > { %2676 = sst [smem:[#allocation38_spill]] %s2675_s15  ;;  %p327_p10 = scmp.eq.s32.totalorder %s2680_s7, 7 }
  0x5c   : > { %s2195_s27 = scalar_select %p308_p6, %s1878_s19, %s310_s10  }
  0x5d   : > { %s2620_s8 = sand.u32 1, %s1890_s22   ;;  %p2202_p12 = por %p327_p10, %p326_p13 }
  0x5e   : > { %2679 = sst [smem:[#allocation40_spill]] %s2195_s27  ;;  %s2208_s1 = sshll.u32 %s2620_s8, 3 }
  0x5f   : > { %s2681_s29 = scalar_select %p2202_p12, 1, 0 }
  0x60   : > { %s2211_s13 = sshll.u32 %s1914_s28, 7  ;;  %s2683_s3 = sld [smem:[#allocation44_spill]] }
  0x61   : > { %2682 = sst [smem:[#allocation41_spill]] %s2681_s29  ;;  %s468_s7 = scalar_lea.vmem [#allocation8], %s2208_s1 }
  0x62   : > { %s475_s21 = sshll.u32 %s468_s7, 4  ;;  %p2684_p0 = scmp.lt.s32.totalorder %s1922_s30, 8  ;;  %s2220_s21 = int_to_ptr.vmem [resolvable:$true] %s475_s21 }
  0x63   : > { %s2686_s28 = sand.u32 1, %s1922_s30  }
  0x64   : > { %p2226_p1 = pnand %p2684_p0, %p2163_p5  ;;  %s2232_s24 = scalar_lea.sflag [#allocation9], %s2686_s28 }
  0x66   : > { %s2217_s10 = scalar_lea.hbm %s2683_s3, %s2211_s13  ;;  %p2238_p6 = pneg %p2226_p1 }
  0x67   : > { %s2685_s8 = scalar_select %p2226_p1, 1, 0 }
  0x68   : > { %s1554_s16 = scalar_lea.hbm %s2217_s10, 128  ;;  %s1559_s27 = scalar_lea.hbm %s2683_s3, 512 }
  0x69   : > { %p1555_p3 = scmp.ne.s32.totalorder %s2217_s10, %s1554_s16  ;;  %p1560_p5 = scmp.lt.u32.totalorder %s2217_s10, %s2683_s3 }
  0x6a   : > { %s2687_s20 = scalar_select %p2238_p6, 1, 0 }
  0x6b   : > { %p1557_p7 = pnand %p2238_p6, %p1555_p3  ;;  %p1561_p10 = scmp.lt.u32.totalorder %s1559_s27, %s1554_s16 }
  0x6c   : > { %p1563_p12 = scmp.lt.u32.totalorder %s1554_s16, %s2217_s10 }
  0x6d   : > { %p1558_p13 = pneg %p1557_p7  ;;  %p1562_p0 = por %p1561_p10, %p1560_p5 }
  0x6f   : > { %p1564_p9 = por %p1563_p12, %p1562_p0 }
  0x71   : > { %p1565_p2 = pnand %p1564_p9, %p1558_p13 }
  0x73   : > { %1568 = shalt.err (!%p1565_p2)
}
  0x74   : > { %s1569_s28 = scalar_lea.vmem %s2220_s21, 128  ;;  %s1925_s9 = smov [#allocation8]  }
  0x75   : > { %p1570_p3 = scmp.ne.s32.totalorder %s2220_s21, %s1569_s28  ;;  %s1574_s7 = sshll.u32 %s1925_s9, 4  ;;  %s1575_s7 = int_to_ptr.vmem [resolvable:$false] %s1574_s7 }
  0x76   : > { %s1576_s19 = scalar_lea.vmem %s1575_s7, 256  ;;  %p1577_p8 = scmp.lt.s32.totalorder %s2220_s21, %s1575_s7 }
  0x77   : > { %p1572_p7 = pnand %p1570_p3, %p2238_p6  ;;  %p1578_p11 = scmp.lt.s32.totalorder %s1576_s19, %s1569_s28 }
  0x79   : > { %p1573_p4 = pneg %p1572_p7  ;;  %p1579_p5 = por %p1578_p11, %p1577_p8 }
  0x7b   : > { %p1580_p10 = pnand %p1579_p5, %p1573_p4 }
  0x7d   : > { %1583 = shalt.err (!%p1580_p10)
}
  0x7e   : > { %1391 = dma.hbm_to_vmem [thread:$0]  (!%p2226_p1), %s2217_s10, 128, %s2220_s21, %s2232_s24  }
  0x7f   : > { %s2688_s0 = sld [smem:[#allocation42_spill]]  ;;  %s411_s28 = scalar_lea.vmem [#allocation2], %s2089_s14 }
  0x80   : > { %s419_s9 = sshll.u32 %s411_s28, 4  ;;  %s2275_s3 = scalar_lea.hbm %s2590_s2, %s2085_s11  ;;  %s2269_s9 = int_to_ptr.vmem [resolvable:$true] %s419_s9 }
  0x81   : > { %s2689_s17 = sand.u32 1, %s1902_s25   ;;  %p2690_p11 = scmp.ne.s32.totalorder %s2661_s26, 0 }
  0x82   : > { %s408_s21 = scalar_lea.sflag [#allocation3], %s2689_s17 }
  0x85   : > { %s2266_s16 = scalar_lea.hbm %s2688_s0, %s2085_s11  ;;  %s1589_s30 = scalar_lea.hbm %s2688_s0, 256 }
  0x86   : > { %s1584_s10 = scalar_lea.hbm %s2266_s16, 128  ;;  %p1590_p9 = scmp.lt.u32.totalorder %s2266_s16, %s2688_s0 }
  0x87   : > { %p1585_p8 = scmp.ne.s32.totalorder %s2266_s16, %s1584_s10  ;;  %p1591_p12 = scmp.lt.u32.totalorder %s1589_s30, %s1584_s10 }
  0x88   : > { %p1593_p0 = scmp.lt.u32.totalorder %s1584_s10, %s2266_s16 }
  0x89   : > { %p1587_p4 = pnand %p1585_p8, %p2690_p11  ;;  %p1592_p13 = por %p1591_p12, %p1590_p9 }
  0x8b   : > { %p1588_p2 = pneg %p1587_p4  ;;  %p1594_p3 = por %p1593_p0, %p1592_p13 }
  0x8d   : > { %p1595_p7 = pnand %p1594_p3, %p1588_p2 }
  0x8f   : > { %1598 = shalt.err (!%p1595_p7)
}
  0x90   : > { %s1599_s11 = scalar_lea.vmem %s2269_s9, 128  ;;  %s1926_s17 = smov [#allocation2]  }
  0x91   : > { %p1600_p5 = scmp.ne.s32.totalorder %s2269_s9, %s1599_s11  ;;  %s1604_s7 = sshll.u32 %s1926_s17, 4  ;;  %s1605_s7 = int_to_ptr.vmem [resolvable:$false] %s1604_s7 }
  0x92   : > { %s1606_s15 = scalar_lea.vmem %s1605_s7, 256  ;;  %p1607_p4 = scmp.lt.s32.totalorder %s2269_s9, %s1605_s7 }
  0x93   : > { %p1602_p10 = pnand %p1600_p5, %p2690_p11  ;;  %p1608_p1 = scmp.lt.s32.totalorder %s1606_s15, %s1599_s11 }
  0x95   : > { %p1603_p8 = pneg %p1602_p10  ;;  %p1609_p9 = por %p1608_p1, %p1607_p4 }
  0x97   : > { %p1610_p12 = pnand %p1609_p9, %p1603_p8 }
  0x99   : > { %1613 = shalt.err (!%p1610_p12)
}
  0x9a   : > { %p2691_p2 = scmp.ne.s32.totalorder %s2659_s23, 0  ;;  %s449_s30 = scalar_lea.vmem [#allocation7], %s2089_s14 }
  0x9b   : > { %s457_s19 = sshll.u32 %s449_s30, 4  ;;  %s2305_s27 = scalar_lea.hbm %s2592_s4, %s2211_s13  ;;  %s458_s19 = int_to_ptr.vmem [resolvable:$true] %s457_s19 }
  0x9c   : > { %1382 = dma.hbm_to_vmem [thread:$0]  (!%p2691_p2), %s2266_s16, 128, %s2269_s9, %s408_s21  }
  0x9d   : > { %s1614_s28 = scalar_lea.hbm %s2275_s3, 128  ;;  %s1619_s7 = scalar_lea.hbm %s2590_s2, 256 }
  0x9e   : > { %p1615_p1 = scmp.ne.s32.totalorder %s2275_s3, %s1614_s28  ;;  %p1620_p3 = scmp.lt.u32.totalorder %s2275_s3, %s2590_s2 }
  0x9f   : > { %p1621_p7 = scmp.lt.u32.totalorder %s1619_s7, %s1614_s28  ;;  %p1623_p10 = scmp.lt.u32.totalorder %s1614_s28, %s2275_s3 }
  0xa0   : > { %p1617_p13 = pnand %p1615_p1, %p2690_p11 }
  0xa1   : > { %p1622_p5 = por %p1621_p7, %p1620_p3 }
  0xa2   : > { %p1618_p0 = pneg %p1617_p13 }
  0xa3   : > { %p1624_p8 = por %p1623_p10, %p1622_p5 }
  0xa5   : > { %p1625_p4 = pnand %p1624_p8, %p1618_p0 }
  0xa7   : > { %1628 = shalt.err (!%p1625_p4)
}
  0xa8   : > { %s1629_s14 = scalar_lea.vmem %s458_s19, 128  ;;  %s1927_s16 = smov [#allocation7]  }
  0xa9   : > { %p1630_p9 = scmp.ne.s32.totalorder %s458_s19, %s1629_s14  ;;  %s1634_s9 = sshll.u32 %s1927_s16, 4  ;;  %s1635_s9 = int_to_ptr.vmem [resolvable:$false] %s1634_s9 }
  0xaa   : > { %s1636_s21 = scalar_lea.vmem %s1635_s9, 256  ;;  %p1637_p13 = scmp.lt.s32.totalorder %s458_s19, %s1635_s9 }
  0xab   : > { %p1632_p12 = pnand %p1630_p9, %p2690_p11  ;;  %p1638_p6 = scmp.lt.s32.totalorder %s1636_s21, %s1629_s14 }
  0xad   : > { %p1633_p1 = pneg %p1632_p12  ;;  %p1639_p2 = por %p1638_p6, %p1637_p13 }
  0xaf   : > { %p1640_p3 = pnand %p1639_p2, %p1633_p1 }
  0xb1   : > { %1643 = shalt.err (!%p1640_p3)
}
  0xb2   : > { %p2692_p7 = scmp.ne.s32.totalorder %s2659_s23, 0  ;;  %s486_s0 = scalar_lea.vmem [#allocation10], %s2208_s1 }
  0xb3   : > { %s493_s26 = sshll.u32 %s486_s0, 4  ;;  %s1644_s30 = scalar_lea.hbm %s2305_s27, 128  ;;  %s494_s26 = int_to_ptr.vmem [resolvable:$true] %s493_s26 }
  0xb4   : > { %1388 = dma.hbm_to_vmem [thread:$0]  (!%p2692_p7), %s2275_s3, 128, %s458_s19, %s2110_s6  }
  0xb5   : > { %p1645_p11 = scmp.ne.s32.totalorder %s2305_s27, %s1644_s30  ;;  %p2693_p0 = scmp.ne.s32.totalorder %s2687_s20, 0 }
  0xb6   : > { %s1649_s23 = scalar_lea.hbm %s2592_s4, 512  ;;  %p1650_p5 = scmp.lt.u32.totalorder %s2305_s27, %s2592_s4 }
  0xb7   : > { %p1647_p6 = pnand %p1645_p11, %p2693_p0  ;;  %p1651_p10 = scmp.lt.u32.totalorder %s1649_s23, %s1644_s30 }
  0xb8   : > { %p1653_p4 = scmp.lt.u32.totalorder %s1644_s30, %s2305_s27 }
  0xb9   : > { %p1648_p2 = pneg %p1647_p6  ;;  %p1652_p8 = por %p1651_p10, %p1650_p5 }
  0xbb   : > { %p1654_p9 = por %p1653_p4, %p1652_p8 }
  0xbd   : > { %p1655_p12 = pnand %p1654_p9, %p1648_p2 }
  0xbf   : > { %1658 = shalt.err (!%p1655_p12)
}
  0xc0   : > { %s1659_s3 = scalar_lea.vmem %s494_s26, 128  ;;  %s1928_s6 = smov [#allocation10]  }
  0xc1   : > { %p1660_p1 = scmp.ne.s32.totalorder %s494_s26, %s1659_s3  ;;  %s1664_s19 = sshll.u32 %s1928_s6, 4  ;;  %s1665_s19 = int_to_ptr.vmem [resolvable:$false] %s1664_s19 }
  0xc2   : > { %s1666_s17 = scalar_lea.vmem %s1665_s19, 256  ;;  %p1667_p7 = scmp.lt.s32.totalorder %s494_s26, %s1665_s19 }
  0xc3   : > { %p1662_p13 = pnand %p1660_p1, %p2693_p0  ;;  %p1668_p11 = scmp.lt.s32.totalorder %s1666_s17, %s1659_s3 }
  0xc5   : > { %p1663_p3 = pneg %p1662_p13  ;;  %p1669_p6 = por %p1668_p11, %p1667_p7 }
  0xc7   : > { %p1670_p5 = pnand %p1669_p6, %p1663_p3 }
  0xc9   : > { %1673 = shalt.err (!%p1670_p5)
}
  0xca   : > { %p2694_p10 = scmp.ne.s32.totalorder %s2685_s8, 0  ;;  %s2348_s14 = scalar_lea.hbm %s2593_s5, %s2211_s13 }
  0xcb   : > { %s504_s16 = scalar_lea.vmem [#allocation11], %s2208_s1  ;;  %s2695_s21 = sand.u32 1, %s1890_s22  }
  0xcc   : > { %1394 = dma.hbm_to_vmem [thread:$0]  (!%p2694_p10), %s2305_s27, 128, %s494_s26, %s2232_s24  }
  0xcd   : > { %s511_s9 = sshll.u32 %s504_s16, 4  ;;  %s501_s0 = scalar_lea.sflag [#allocation12], %s2695_s21  ;;  %s512_s9 = int_to_ptr.vmem [resolvable:$true] %s511_s9 }
  0xce   : > { %s1674_s30 = scalar_lea.hbm %s2348_s14, 128  ;;  %s1679_s26 = scalar_lea.hbm %s2593_s5, 512 }
  0xcf   : > { %p1675_p2 = scmp.ne.s32.totalorder %s2348_s14, %s1674_s30  ;;  %p1680_p9 = scmp.lt.u32.totalorder %s2348_s14, %s2593_s5 }
  0xd0   : > { %p1681_p12 = scmp.lt.u32.totalorder %s1679_s26, %s1674_s30  ;;  %p1683_p13 = scmp.lt.u32.totalorder %s1674_s30, %s2348_s14 }
  0xd1   : > { %p1677_p8 = pnand %p1675_p2, %p2693_p0 }
  0xd2   : > { %p1682_p1 = por %p1681_p12, %p1680_p9 }
  0xd3   : > { %p1678_p4 = pneg %p1677_p8 }
  0xd4   : > { %p1684_p3 = por %p1683_p13, %p1682_p1 }
  0xd6   : > { %p1685_p7 = pnand %p1684_p3, %p1678_p4 }
  0xd8   : > { %1688 = shalt.err (!%p1685_p7)
}
  0xd9   : > { %s1689_s1 = scalar_lea.vmem %s512_s9, 128  ;;  %s1929_s29 = smov [#allocation11]  }
  0xda   : > { %p1690_p11 = scmp.ne.s32.totalorder %s512_s9, %s1689_s1  ;;  %s1694_s23 = sshll.u32 %s1929_s29, 4  ;;  %s1695_s23 = int_to_ptr.vmem [resolvable:$false] %s1694_s23 }
  0xdb   : > { %s1696_s28 = scalar_lea.vmem %s1695_s23, 256  ;;  %p1697_p2 = scmp.lt.s32.totalorder %s512_s9, %s1695_s23 }
  0xdc   : > { %p1692_p6 = pnand %p1690_p11, %p2693_p0  ;;  %p1698_p8 = scmp.lt.s32.totalorder %s1696_s28, %s1689_s1 }
  0xde   : > { %p1693_p5 = pneg %p1692_p6  ;;  %p1699_p10 = por %p1698_p8, %p1697_p2 }
  0xe0   : > { %p1700_p9 = pnand %p1699_p10, %p1693_p5 }
  0xe2   : > { %1703 = shalt.err (!%p1700_p9)
}
  0xe3   : > { %p2696_p12 = scmp.ne.s32.totalorder %s2685_s8, 0  ;;  %s2697_s11 = sld [smem:[#allocation33_spill]] }
  0xe5   : > { %1397 = dma.hbm_to_vmem [thread:$0]  (!%p2696_p12), %s2348_s14, 128, %s512_s9, %s501_s0  }
  0xe9   : > { %p2698_p4 = scmp.ne.s32.totalorder %s2697_s11, 0 }
  0xea   : > { %s2699_s3 = sld [smem:[#allocation26_spill]] (!%p2698_p4)  ;;  %s2700_s20 = sld [smem:[#allocation32_spill]] (!%p2698_p4) }
  0xeb   : > { %538 = sbr.rel (%p2698_p4) target bundleno = 541 (0x21d), region = 56 }
  0xf0   : > { %s540_s6 = sand.u32 (!%p2698_p4), 1, %s2699_s3   ;;  %p2701_p0 = scmp.ne.s32.totalorder (!%p2698_p4), %s2700_s20, 0 }
  0xf1   : > { %s2373_s19 = sshll.u32 (!%p2698_p4), %s540_s6, 3  ;;  %s541_s17 = scalar_lea.sflag (!%p2698_p4), [#allocation3], %s540_s6 }
  0xf2   : > { %s544_s7 = scalar_lea.vmem [#allocation2], %s2373_s19 }
  0xf3   : > { %1845 = dma.done.wait (%p2701_p0), %s541_s17, 128  }
  0xf4   : > { %1847 = vsyncadd (%p2701_p0), %s541_s17, 4294967168  ;;  %s2381_s8 = sand.u32 1, %s2064_s12   ;;  %s553_s14 = scalar_lea.vmem [#allocation5], %s2373_s19 }
  0xf5   : > { %s550_s15 = scalar_lea.sflag [#allocation6], %s2381_s8 }
  0xf6   : > { %1849 = dma.done.wait (%p2701_p0), %s550_s15, 256  }
  0xf7   : > { %1851 = vsyncadd (%p2701_p0), %s550_s15, 4294967040  ;;  %s2702_s16 = sld [smem:[#allocation25_spill]]  ;;  %s2703_s9 = sld [smem:[#allocation35_spill]] }
  0xf8   : > { %s562_s30 = scalar_lea.vmem [#allocation7], %s2373_s19  ;;  %s568_s24 = scalar_lea.sflag [#allocation9], %s2381_s8 }
  0xfd   : > { %s569_s21 = sand.u32 1, %s2702_s16   ;;  %p2704_p10 = scmp.ne.s32.totalorder %s2703_s9, 0 }
  0xfe   : > { %s1314_s0 = sshll.u32 %s569_s21, 3 }
  0xff   : > { %s571_s27 = scalar_lea.vmem [#allocation8], %s1314_s0 }
 0x100   : > { %1853 = dma.done.wait (%p2704_p10), %s568_s24, 256  }
 0x101   : > { %1855 = vsyncadd (%p2704_p10), %s568_s24, 4294967040  ;;  %s580_s12 = scalar_lea.vmem [#allocation10], %s1314_s0  ;;  %s586_s26 = scalar_lea.sflag [#allocation12], %s569_s21 }
 0x102   : > { %s589_s13 = scalar_lea.vmem [#allocation11], %s1314_s0 }
 0x103   : > { %1857 = dma.done.wait (%p2704_p10), %s586_s26, 128  }
 0x104   : > { %1859 = vsyncadd (%p2704_p10), %s586_s26, 4294967168  ;;  %v1930_v0 = vmov 0.0   ;;  %vm1931_vm0 = vmmov 0   ;;  %s2705_s10 = sld [smem:[#allocation27_spill]]  ;;  %vm692_vm1 = vcmask 261120   ;;  %v684_v1 = vld [vmem:[%s571_s27] sm:$0xff] }
 0x105   : > { %1346 = vmatprep.subr.mxu0 %v1930_v0  ;;  %1348 = vmatprep.mubr.msk.f32.mxu0 %vm1931_vm0, %v1930_v0  ;;  %v769_v2 = vld [vmem:[%s580_s12] sm:$0xff]  ;;  %s2706_s1 = sld [smem:[#allocation28_spill]]  ;;  %v682_v4 = vld [vmem:[%s553_s14] sm:$0xff]  ;;  %s655_s29 = sand.u32 1, %s1874_s18   ;;  %vm938_vm2 = vcmask 64512  }
 0x106   : > { %1351 = vmatprep.subr.mxu1 %v1930_v0  ;;  %1353 = vmatprep.mubr.msk.f32.mxu1 %vm1931_vm0, %v1930_v0  ;;  %v681_v3 = vld [vmem:[%s544_s7] sm:$0xff]  ;;  %v853_v5 = vld [vmem:[%s589_s13] sm:$0xff]  ;;  %s2408_s28 = sshll.u32 %s655_s29, 3  ;;  %s2707_s6 = sld [smem:[#allocation45_spill]] }
 0x107   : > { %1347 = vmatpush3.xpose.msk.msra.mxu0 %vm692_vm1, %v684_v1  ;;  %1352 = vmatpush3.xpose.msk.msra.mxu1 %vm692_vm1, %v769_v2  ;;  %v683_v6 = vld [vmem:[%s562_s30] sm:$0xff]  ;;  %s2708_s15 = sld [smem:[#allocation46_spill]]  ;;  %s664_s21 = scalar_lea.vmem [#allocation14], %s2408_s28 }
 0x108   : > { %1356 = vmatprep.subr.mxu0 %v1930_v0  ;;  %s985_s0 = sshll.u32 %s664_s21, 4  ;;  %s2709_s27 = sld [smem:[#allocation47_spill]]  ;;  %s2433_s0 = int_to_ptr.vmem [resolvable:$true] %s985_s0 }
 0x109   : > { %s657_s26 = scalar_lea.vmem [#allocation13], %s2408_s28  ;;  %s2711_s3 = sld [smem:[#allocation49_spill]] }
 0x10a   : > { %1349 = vmatmul.mubr.msk.f32.vlgmr.msra.gmra.mrb[0].mxu0 %vm692_vm1, %v681_v3  ;;  %1354 = vmatmul.mubr.msk.f32.vlgmr.msra.gmra.mrb[0].mxu1 %vm692_vm1, %v682_v4  ;;  %p672_p1 = scmp.lt.s32.totalorder %s2705_s10, 3  ;;  %s969_s13 = sshll.u32 %s657_s26, 4  ;;  %s2447_s13 = int_to_ptr.vmem [resolvable:$true] %s969_s13 }
 0x10b   : > { %1357 = vmatpush3.xpose.msk.msra.mxu0 %vm692_vm1, %v853_v5  ;;  %1358 = vmatprep.mubr.msk.f32.mxu0 %vm1931_vm0, %v1930_v0  ;;  %s1332_s11 = sshll.u32 %s2706_s1, 2  ;;  %s2712_s7 = sld [smem:[#allocation48_spill]] }
 0x10c   : > { %s673_s23 = scalar_select %p672_p1, %s2705_s10, 3 }
 0x10d   : > { %s965_s16 = sadd.s32 %s2705_s10, %s1332_s11  ;;  %s2710_s10 = sld [smem:[#allocation38_spill]] }
 0x10e   : > { %1359 = vmatmul.mubr.msk.f32.vlgmr.msra.gmra.mrb[2].mxu0 %vm692_vm1, %v683_v6  ;;  %s674_s19 = scalar_lea.vmem %s2707_s6, %s673_s23  ;;  %s677_s14 = scalar_lea.vmem %s2708_s15, %s673_s23 }
 0x10f   : > { %v1320_v7 = vld [vmem:[%s674_s19] ss:$0 sm:$0xff]  ;;  %s2418_s9 = sshll.u32 %s965_s16, 7  ;;  %s680_s12 = scalar_lea.vmem %s2709_s27, %s673_s23 }
 0x110   : > { %v1323_v8 = vld [vmem:[%s677_s14] ss:$0 sm:$0xff]  ;;  %s2431_s20 = scalar_lea.hbm %s2711_s3, %s2418_s9  ;;  %s671_s23 = scalar_lea.vmem [#allocation16], %s2408_s28 }
 0x111   : > { %v1326_v15 = vld [vmem:[%s680_s12] ss:$0 sm:$0xff]  ;;  %s2438_s6 = sshll.u32 %s671_s23, 4  ;;  %s2445_s15 = scalar_lea.hbm %s2712_s7, %s2418_s9  ;;  %s2483_s6 = int_to_ptr.vmem [resolvable:$true] %s2438_s6 }
 0x112   : > { %s948_s14 = scalar_lea.sflag [#allocation15], %s2381_s8  ;;  %s1704_s16 = scalar_lea.vmem %s2433_s0, 128 }
 0x113   : > { %p1705_p13 = scmp.ne.s32.totalorder %s2433_s0, %s1704_s16  ;;  %p2713_p3 = scmp.ne.s32.totalorder %s2710_s10, 0 }
 0x114   : > { %s1932_s30 = smov [#allocation14]  }
 0x115   : > { %p1706_p7 = pnand %p1705_p13, %p2713_p3  ;;  %s1708_s24 = sshll.u32 %s1932_s30, 4  ;;  %s1709_s24 = int_to_ptr.vmem [resolvable:$false] %s1708_s24 }
 0x116   : > { %s1710_s27 = scalar_lea.vmem %s1709_s24, 256  ;;  %p1711_p6 = scmp.lt.s32.totalorder %s2433_s0, %s1709_s24 }
 0x117   : > { %p1707_p11 = pneg %p1706_p7  ;;  %p1712_p5 = scmp.lt.s32.totalorder %s1710_s27, %s1704_s16 }
 0x119   : > { %p1713_p2 = por %p1712_p5, %p1711_p6 }
 0x11b   : > { %p1714_p8 = pnand %p1713_p2, %p1707_p11 }
 0x1dd   : > { %v765_v9 = vpop.f32.mrb[0].mxu0  ;;  %v849_v10 = vpop.f32.mrb[0].mxu1 }
 0x1de   : > { %v766_v11 = vadd.f32 %v1320_v7, %v765_v9  ;;  %v1350_v12 = vpop.f32.mrb[1].mxu0  ;;  %v850_v13 = vadd.f32 %v1323_v8, %v849_v10  ;;  %v1355_v14 = vpop.f32.mrb[1].mxu1 }
 0x1e0   : > { %v937_v16 = vmul.f32 0.35355338, %v766_v11  ;;  %940 = vst.msk [vmem:[%s664_s21] sm:$0xff] %vm938_vm2, %v850_v13 }
 0x1e1   : > { %v933_v17 = vpop.f32.mrb[2].mxu0 }
 0x1e2   : > { %1717 = shalt.err (!%p1714_p8)
}
 0x1e3   : > { %s1718_s21 = scalar_lea.hbm %s2431_s20, 128  ;;  %s1722_s11 = scalar_lea.hbm %s2711_s3, 1024 }
 0x1e4   : > { %p1719_p9 = scmp.ne.s32.totalorder %s2431_s20, %s1718_s21  ;;  %p1723_p0 = scmp.lt.u32.totalorder %s2431_s20, %s2711_s3 }
 0x1e5   : > { %p1724_p10 = scmp.lt.u32.totalorder %s1722_s11, %s1718_s21  ;;  %p1726_p13 = scmp.lt.u32.totalorder %s1718_s21, %s2431_s20 }
 0x1e6   : > { %p1720_p12 = pnand %p1719_p9, %p2713_p3 }
 0x1e7   : > { %p1725_p1 = por %p1724_p10, %p1723_p0 }
 0x1e8   : > { %p1721_p4 = pneg %p1720_p12 }
 0x1e9   : > { %p1727_p7 = por %p1726_p13, %p1725_p1 }
 0x1eb   : > { %p1728_p11 = pnand %p1727_p7, %p1721_p4 }
 0x1ed   : > { %1731 = shalt.err (!%p1728_p11)
}
 0x1ee   : > { %1374 = dma.vmem_to_hbm [thread:$0]  (%p2713_p3), %s2433_s0, 128, %s2431_s20, %s948_s14   ;;  %v934_v18 = vadd.f32 %v1326_v15, %v933_v17  ;;  %v1360_v19 = vpop.f32.mrb[3].mxu0  ;;  %939 = vst.msk [vmem:[%s657_s26] sm:$0xff] %vm938_vm2, %v937_v16 }
 0x1ef   : > { %s2714_s24 = sld [smem:[#allocation50_spill]]  ;;  %s943_s21 = scalar_lea.sflag [#allocation4], %s655_s29 }
 0x1f0   : > { %s1732_s1 = scalar_lea.vmem %s2447_s13, 128  ;;  %s1933_s0 = smov [#allocation13]  }
 0x1f1   : > { %p1733_p6 = scmp.ne.s32.totalorder %s2447_s13, %s1732_s1  ;;  %s1736_s20 = sshll.u32 %s1933_s0, 4  ;;  %s1737_s20 = int_to_ptr.vmem [resolvable:$false] %s1736_s20 }
 0x1f2   : > { %s1738_s11 = scalar_lea.vmem %s1737_s20, 256  ;;  %p1739_p8 = scmp.lt.s32.totalorder %s2447_s13, %s1737_s20 }
 0x1f3   : > { %p1734_p5 = pnand %p1733_p6, %p2713_p3  ;;  %p1740_p9 = scmp.lt.s32.totalorder %s1738_s11, %s1732_s1 }
 0x1f5   : > { %s2715_s12 = smov %s2714_s24  ;;  %s2480_s27 = scalar_lea.hbm %s2714_s24, %s2418_s9 }
 0x1f6   : > { %p1735_p2 = pneg %p1734_p5  ;;  %p1741_p12 = por %p1740_p9, %p1739_p8 }
 0x1f8   : > { %p1742_p4 = pnand %p1741_p12, %p1735_p2 }
 0x1fa   : > { %1745 = shalt.err (!%p1742_p4)
}
 0x1fb   : > { %s1746_s29 = scalar_lea.hbm %s2445_s15, 128  ;;  %s1750_s19 = scalar_lea.hbm %s2712_s7, 1024 }
 0x1fc   : > { %p1747_p0 = scmp.ne.s32.totalorder %s2445_s15, %s1746_s29  ;;  %p1751_p13 = scmp.lt.u32.totalorder %s2445_s15, %s2712_s7 }
 0x1fd   : > { %p1752_p7 = scmp.lt.u32.totalorder %s1750_s19, %s1746_s29  ;;  %p1754_p6 = scmp.lt.u32.totalorder %s1746_s29, %s2445_s15 }
 0x1fe   : > { %p1748_p10 = pnand %p1747_p0, %p2713_p3 }
 0x1ff   : > { %p1753_p11 = por %p1752_p7, %p1751_p13 }
 0x200   : > { %p1749_p1 = pneg %p1748_p10 }
 0x201   : > { %p1755_p5 = por %p1754_p6, %p1753_p11 }
 0x203   : > { %p1756_p2 = pnand %p1755_p5, %p1749_p1 }
 0x205   : > { %1759 = shalt.err (!%p1756_p2)
}
 0x206   : > { %1373 = dma.vmem_to_hbm [thread:$0]  (%p2713_p3), %s2447_s13, 128, %s2445_s15, %s943_s21   ;;  %941 = vst.msk [vmem:[%s671_s23] sm:$0xff] %vm938_vm2, %v934_v18 }
 0x207   : > { %s1760_s30 = scalar_lea.vmem %s2483_s6, 128  ;;  %s1934_s24 = smov [#allocation16]  }
 0x208   : > { %p1761_p8 = scmp.ne.s32.totalorder %s2483_s6, %s1760_s30  ;;  %s1764_s1 = sshll.u32 %s1934_s24, 4  ;;  %s1765_s1 = int_to_ptr.vmem [resolvable:$false] %s1764_s1 }
 0x209   : > { %s1766_s0 = scalar_lea.vmem %s1765_s1, 256  ;;  %p1767_p4 = scmp.lt.s32.totalorder %s2483_s6, %s1765_s1 }
 0x20a   : > { %p1762_p9 = pnand %p1761_p8, %p2713_p3  ;;  %p1768_p0 = scmp.lt.s32.totalorder %s1766_s0, %s1760_s30 }
 0x20c   : > { %p1763_p12 = pneg %p1762_p9  ;;  %p1769_p10 = por %p1768_p0, %p1767_p4 }
 0x20e   : > { %p1770_p1 = pnand %p1769_p10, %p1763_p12 }
 0x210   : > { %1773 = shalt.err (!%p1770_p1)
}
 0x211   : > { %s1774_s28 = scalar_lea.hbm %s2480_s27, 128  ;;  %s1778_s15 = scalar_lea.hbm %s2715_s12, 1024 }
 0x212   : > { %p1775_p13 = scmp.ne.s32.totalorder %s2480_s27, %s1774_s28  ;;  %p1779_p6 = scmp.lt.u32.totalorder %s2480_s27, %s2715_s12 }
 0x213   : > { %p1780_p5 = scmp.lt.u32.totalorder %s1778_s15, %s1774_s28  ;;  %p1782_p8 = scmp.lt.u32.totalorder %s1774_s28, %s2480_s27 }
 0x214   : > { %p1776_p7 = pnand %p1775_p13, %p2713_p3 }
 0x215   : > { %p1781_p2 = por %p1780_p5, %p1779_p6 }
 0x216   : > { %p1777_p11 = pneg %p1776_p7 }
 0x217   : > { %p1783_p9 = por %p1782_p8, %p1781_p2 }
 0x219   : > { %p1784_p12 = pnand %p1783_p9, %p1777_p11 }
 0x21b   : > { %1787 = shalt.err (!%p1784_p12)
}
 0x21c   : > { %1375 = dma.vmem_to_hbm [thread:$0]  (%p2713_p3), %s2483_s6, 128, %s2480_s27, %s948_s14  }
 0x21d PF: > { %s2716_s11 = sld [smem:[#allocation31_spill]]  ;;  %s2717_s29 = sld [smem:[#allocation23_spill]] }
 0x21e   : > { %s2718_s9 = sld [smem:[#allocation41_spill]] }
 0x223   : > { %p1409_p4 = scmp.ge.s32.totalorder %s2716_s11, 2  ;;  %s1013_s26 = sand.u32 1, %s2717_s29  }
 0x224   : > { %p2719_p0 = scmp.ne.s32.totalorder %s2718_s9, 0  ;;  %s1014_s19 = scalar_lea.sflag [#allocation4], %s1013_s26 }
 0x226   : > { %p1399_p10 = pnand %p1409_p4, %p2719_p0 }
 0x228   : > { %1861 = dma.done.wait (!%p1399_p10), %s1014_s19, 128  }
 0x229   : > { %1863 = vsyncadd (!%p1399_p10), %s1014_s19, 4294967168  ;;  %s2720_s17 = sadd.s32 4294967294, %s2716_s11  }
 0x22a   : > { %s1022_s16 = sand.u32 1, %s2720_s17  }
 0x22b   : > { %s1023_s10 = scalar_lea.sflag [#allocation15], %s1022_s16 }
 0x22c   : > { %1865 = dma.done.wait (!%p1399_p10), %s1023_s10, 256  }
 0x22d   : > { %1867 = vsyncadd (!%p1399_p10), %s1023_s10, 4294967040  ;;  %s40_s30 = sadd.s32 1, %s2716_s11   ;;  %s2722_s6 = sld [smem:[#allocation24_spill]] }
 0x22e   : > { %p2541_p3 = scmp.ge.s32.totalorder %s40_s30, 10   ;;  %s2723_s19 = sld [smem:[#allocation40_spill]] }
 0x22f   : > { %s2724_s20 = sld [smem:[#allocation25_spill]]  ;;  %s2725_s14 = sld [smem:[#allocation37_spill]] }
 0x230   : > { %s2726_s23 = sld [smem:[#allocation26_spill]]  ;;  %s2727_s27 = sld [smem:[#allocation39_spill]] }
 0x231   : > { %s2728_s26 = sld [smem:[#allocation29_spill]]  ;;  %s2729_s1 = sld [smem:[#allocation30_spill]] }
 0x232   : > { %s2730_s28 = sld [smem:[#allocation34_spill]]  ;;  %s2731_s29 = sld [smem:[#allocation36_spill]] }
 0x233   : > { %s2732_s17 = smov %s1874_s18  ;;  %s2733_s18 = smov %s2722_s6 }
 0x234   : > { %s2734_s21 = smov %s1890_s22  ;;  %s2736_s24 = smov %s1902_s25 }
 0x235   : > { %s2735_s22 = smov %s2725_s14  ;;  %39 = sbr.rel (!%p2541_p3) target bundleno = 28 (0x1c), region = 203 }
 0x236   : > { %s2737_s25 = smov %s2727_s27 }
 0x237   : > { %s2738_s27 = smov %s2729_s1 }
 0x23c   :  { %1037 = vsyncpa [#allocation3], 1 }
 0x23d   :  { %1039 = vsyncpa [#allocation3 + $0x1], 1 }
 0x23e   :  { %1040 = vsyncpa [#allocation6], 1 }
 0x23f   :  { %1042 = vsyncpa [#allocation6 + $0x1], 1 }
 0x240   :  { %1043 = vsyncpa [#allocation9], 1 }
 0x241   :  { %1045 = vsyncpa [#allocation9 + $0x1], 1 }
 0x242   :  { %1046 = vsyncpa [#allocation12], 1 }
 0x243   :  { %1048 = vsyncpa [#allocation12 + $0x1], 1 }
 0x244   :  { %1049 = vsyncpa [#allocation4], 1 }
 0x245   :  { %1051 = vsyncpa [#allocation4 + $0x1], 1 }
 0x246   :  { %1052 = vsyncpa [#allocation15], 1 }
 0x247   :  { %1054 = vsyncpa [#allocation15 + $0x1], 1 }

</bundles_post_ra>
